<compile_context>
chip_gen: v6e
topology: v6e:2x2x1
jax: 0.10.0
libtpu: 0.0.40
codegen_flags: <defaults>
</compile_context>

<pallas_src>
import functools

import jax
import jax.numpy as jnp
from jax import lax
from jax.experimental import pallas as pl
from jax.experimental.pallas import tpu as pltpu


def _layer_norm(x, gamma, beta, eps=1e-5):
    mu = jnp.mean(x, axis=-1, keepdims=True)
    var = jnp.mean((x - mu) ** 2, axis=-1, keepdims=True)
    return (x - mu) * lax.rsqrt(var + eps) * gamma + beta


def _elu_plus_one(z):
    # F.elu(z) + 1  ==  z + 1 if z > 0 else exp(z)
    return jnp.where(z > 0, z + 1.0, jnp.exp(z))


def encoder_layer_kernel(
    x_ref,
    wq_ref, bq_ref, wk_ref, bk_ref, wv_ref, bv_ref, wo_ref, bo_ref,
    w1_ref, b1_ref, w2_ref, b2_ref,
    g1_ref, be1_ref, g2_ref, be2_ref,
    o_ref,
):
    # One grid step == one batch element's (S, D) slab (rows are batch-
    # contiguous thanks to the wrapper relayout), so the per-batch KV needs
    # no masking and does no cross-batch redundant work.
    mxu_dtype = wq_ref.dtype
    x = x_ref[...].astype(jnp.float32)   # f32 for LN / residual math

    def matmul(a, w_ref, b_ref):
        # Cast only the MXU operand; accumulate in f32; bias add in f32.
        return jnp.dot(a.astype(mxu_dtype), w_ref[...],
                       preferred_element_type=jnp.float32) + b_ref[...]

    # ---- Q/K/V projections (ELU / elementwise math stays f32).
    q = _elu_plus_one(matmul(x, wq_ref, bq_ref))
    k = _elu_plus_one(matmul(x, wk_ref, bk_ref))
    v = matmul(x, wv_ref, bv_ref)

    # ---- Linear attention for this batch:
    #   KV = K^T V  (contract dim 0 of both operands on the MXU — no k.T),
    #   attn = Q @ KV, then output projection.
    kv = lax.dot_general(k.astype(mxu_dtype), v.astype(mxu_dtype),
                         (((0,), (0,)), ((), ())),
                         preferred_element_type=jnp.float32)
    attn = jnp.dot(q.astype(mxu_dtype), kv.astype(mxu_dtype),
                   preferred_element_type=jnp.float32)
    attn = matmul(attn, wo_ref, bo_ref)

    # ---- Residual + LayerNorm 1 (dropout1 is identity in eval mode).
    src = _layer_norm(x + attn, g1_ref[...], be1_ref[...])

    # ---- Feed-forward (dropout is identity in eval mode).  h is only (S, F)
    # per grid step — never the full (B*S, F) slab.
    h = jnp.maximum(matmul(src, w1_ref, b1_ref), 0.0)
    ff = matmul(h, w2_ref, b2_ref)

    # ---- Residual + LayerNorm 2 (dropout2 is identity in eval mode).
    src = _layer_norm(src + ff, g2_ref[...], be2_ref[...])
    o_ref[...] = src.astype(o_ref.dtype)


def custom_transformer_encoder_layer(src, params, *, mxu_dtype=jnp.float32,
                                     vmem_limit_bytes=None):
    """src: (S, B, D) float32 (PyTorch seq-first convention). Returns (S, B, D)."""
    S, B, D = src.shape
    F = params["w1"].shape[1]

    # Batch-major relayout: one cheap HBM transpose (4*S*B*D bytes) buys a
    # mask-free per-batch attention (drops ~B x redundant MXU/VPU work).
    xb = jnp.transpose(src, (1, 0, 2)).reshape(B * S, D)

    def wcast(name):
        return params[name].astype(mxu_dtype)

    args = (
        xb,
        wcast("wq"), params["bq"], wcast("wk"), params["bk"],
        wcast("wv"), params["bv"], wcast("wo"), params["bo"],
        wcast("w1"), params["b1"], wcast("w2"), params["b2"],
        params["g1"], params["be1"], params["g2"], params["be2"],
    )

    # Activations: one batch element's S contiguous rows per grid step.
    x_spec = pl.BlockSpec((S, D), lambda b: (b, 0))

    # Weights / biases / LN params: full block, same block index every step
    # -> fetched once, resident in VMEM, no per-step re-DMA.
    def resident(p):
        return pl.BlockSpec(p.shape, lambda b: tuple(0 for _ in p.shape))

    in_specs = [x_spec] + [resident(a) for a in args[1:]]

    itemsize = jnp.dtype(mxu_dtype).itemsize
    weight_bytes = (4 * D * D + 2 * D * F) * itemsize + (9 * D + F) * 4
    act_bytes = (8 * S * D + 2 * S * F + D * D) * 4
    if vmem_limit_bytes is None:
        # Explicit scoped-VMEM limit (v5e default is only 16 MiB); headroom
        # for double-buffered activation tiles, capped below v7x's 64 MiB.
        vmem_limit_bytes = min(max(4 * (weight_bytes + act_bytes), 16 << 20),
                               56 << 20)

    cost = pl.CostEstimate(
        flops=2 * B * S * (6 * D * D + 2 * D * F),   # matches the implemented work
        transcendentals=2 * B * S * D,
        bytes_accessed=8 * B * S * D + weight_bytes,
    )

    out = pl.pallas_call(
        encoder_layer_kernel,
        out_shape=jax.ShapeDtypeStruct((B * S, D), src.dtype),
        grid=(B,),
        in_specs=in_specs,
        out_specs=x_spec,
        compiler_params=pltpu.CompilerParams(
            dimension_semantics=("parallel",),   # v7x: 2 TCs split the batch axis
            vmem_limit_bytes=int(vmem_limit_bytes),
        ),
        cost_estimate=cost,
    )(*args)

    # Back to the PyTorch (S, B, D) layout.
    return jnp.transpose(out.reshape(B, S, D), (1, 0, 2))


def init_params(key, d_model, dim_feedforward):
    """Deterministic synthetic params.  Weights stored pre-transposed as (in, out)."""
    keys = jax.random.split(key, 12)
    s = 1.0 / jnp.sqrt(d_model)
    sf = 1.0 / jnp.sqrt(dim_feedforward)

    def lin(kw, kb, din, dout, scale):
        w = jax.random.uniform(kw, (din, dout), jnp.float32, -scale, scale)
        b = jax.random.uniform(kb, (1, dout), jnp.float32, -scale, scale)
        return w, b

    wq, bq = lin(keys[0], keys[1], d_model, d_model, s)
    wk, bk = lin(keys[2], keys[3], d_model, d_model, s)
    wv, bv = lin(keys[4], keys[5], d_model, d_model, s)
    wo, bo = lin(keys[6], keys[7], d_model, d_model, s)
    w1, b1 = lin(keys[8], keys[9], d_model, dim_feedforward, s)
    w2, b2 = lin(keys[10], keys[11], dim_feedforward, d_model, sf)

    return {
        "wq": wq, "bq": bq, "wk": wk, "bk": bk, "wv": wv, "bv": bv,
        "wo": wo, "bo": bo, "w1": w1, "b1": b1, "w2": w2, "b2": b2,
        "g1": jnp.ones((1, d_model), jnp.float32),
        "be1": jnp.zeros((1, d_model), jnp.float32),
        "g2": jnp.ones((1, d_model), jnp.float32),
        "be2": jnp.zeros((1, d_model), jnp.float32),
    }


def reference(src, p):
    """Pure-JAX reference mirroring the PyTorch forward (eval mode)."""
    def elu1(z):
        return jnp.where(z > 0, z + 1.0, jnp.exp(z))

    def ln(x, g, b, eps=1e-5):
        mu = jnp.mean(x, axis=-1, keepdims=True)
        var = jnp.mean((x - mu) ** 2, axis=-1, keepdims=True)
        return (x - mu) / jnp.sqrt(var + eps) * g + b

    q = elu1(src @ p["wq"] + p["bq"][0])
    k = elu1(src @ p["wk"] + p["bk"][0])
    v = src @ p["wv"] + p["bv"][0]
    # (S,B,D): K.permute(1,2,0) -> (B,D,S), V.permute(1,0,2) -> (B,S,D)
    kv = jnp.einsum("sbd,sbe->bde", k, v)
    out = jnp.einsum("sbd,bde->sbe", q, kv)
    out = out @ p["wo"] + p["bo"][0]
    src = ln(src + out, p["g1"][0], p["be1"][0])
    ff = jnp.maximum(src @ p["w1"] + p["b1"][0], 0.0) @ p["w2"] + p["b2"][0]
    src = ln(src + ff, p["g2"][0], p["be2"][0])
    return src


if __name__ == "__main__":
    d_model = 32
    dim_feedforward = 64
    seq_len = 8
    batch = 2

    key = jax.random.PRNGKey(0)
    k_x, k_p = jax.random.split(key)
    src = jax.random.normal(k_x, (seq_len, batch, d_model), jnp.float32)
    params = init_params(k_p, d_model, dim_feedforward)

    ref = reference(src, params)

    # fp32-MXU path: tight tolerance against the f32 reference.
    out_f32 = jax.block_until_ready(
        custom_transformer_encoder_layer(src, params, mxu_dtype=jnp.float32))
    assert out_f32.shape == (seq_len, batch, d_model)
    assert jnp.allclose(out_f32, ref, atol=1e-4, rtol=1e-4)

    # bf16-MXU path (what real model sizes should use on v5e/v6e/v7x):
    # looser tolerance since MXU operands are rounded to bf16.
    out_bf16 = jax.block_until_ready(
        custom_transformer_encoder_layer(src, params, mxu_dtype=jnp.bfloat16))
    assert out_bf16.shape == (seq_len, batch, d_model)
    assert jnp.allclose(out_bf16, ref, atol=5e-2, rtol=5e-2)

    print("KERNEL_OK")
</pallas_src>

<mosaic_0001>
module attributes {stable_mosaic.version = 11 : i64} {
  func.func @encoder_layer_kernel(%arg0: i32, %arg1: memref<8x32xf32, #tpu.memory_space<vmem>>, %arg2: memref<32x32xf32, #tpu.memory_space<vmem>>, %arg3: memref<1x32xf32, #tpu.memory_space<vmem>>, %arg4: memref<32x32xf32, #tpu.memory_space<vmem>>, %arg5: memref<1x32xf32, #tpu.memory_space<vmem>>, %arg6: memref<32x32xf32, #tpu.memory_space<vmem>>, %arg7: memref<1x32xf32, #tpu.memory_space<vmem>>, %arg8: memref<32x32xf32, #tpu.memory_space<vmem>>, %arg9: memref<1x32xf32, #tpu.memory_space<vmem>>, %arg10: memref<32x64xf32, #tpu.memory_space<vmem>>, %arg11: memref<1x64xf32, #tpu.memory_space<vmem>>, %arg12: memref<64x32xf32, #tpu.memory_space<vmem>>, %arg13: memref<1x32xf32, #tpu.memory_space<vmem>>, %arg14: memref<1x32xf32, #tpu.memory_space<vmem>>, %arg15: memref<1x32xf32, #tpu.memory_space<vmem>>, %arg16: memref<1x32xf32, #tpu.memory_space<vmem>>, %arg17: memref<1x32xf32, #tpu.memory_space<vmem>>, %arg18: memref<8x32xf32, #tpu.memory_space<vmem>>) attributes {dimension_semantics = [#tpu.dimension_semantics<parallel>], iteration_bounds = array<i64: 2>, scalar_prefetch = 0 : i64, scratch_operands = 0 : i64, tpu.core_type = #tpu.core_type<tc>, window_params = [{transform_indices = @transform_0, window_bounds = array<i64: 8, 32>}, {pipeline_mode = #tpu.pipeline_mode<synchronous>, transform_indices = @transform_1, window_bounds = array<i64: 32, 32>}, {pipeline_mode = #tpu.pipeline_mode<synchronous>, transform_indices = @transform_2, window_bounds = array<i64: 1, 32>}, {pipeline_mode = #tpu.pipeline_mode<synchronous>, transform_indices = @transform_3, window_bounds = array<i64: 32, 32>}, {pipeline_mode = #tpu.pipeline_mode<synchronous>, transform_indices = @transform_4, window_bounds = array<i64: 1, 32>}, {pipeline_mode = #tpu.pipeline_mode<synchronous>, transform_indices = @transform_5, window_bounds = array<i64: 32, 32>}, {pipeline_mode = #tpu.pipeline_mode<synchronous>, transform_indices = @transform_6, window_bounds = array<i64: 1, 32>}, {pipeline_mode = #tpu.pipeline_mode<synchronous>, transform_indices = @transform_7, window_bounds = array<i64: 32, 32>}, {pipeline_mode = #tpu.pipeline_mode<synchronous>, transform_indices = @transform_8, window_bounds = array<i64: 1, 32>}, {pipeline_mode = #tpu.pipeline_mode<synchronous>, transform_indices = @transform_9, window_bounds = array<i64: 32, 64>}, {pipeline_mode = #tpu.pipeline_mode<synchronous>, transform_indices = @transform_10, window_bounds = array<i64: 1, 64>}, {pipeline_mode = #tpu.pipeline_mode<synchronous>, transform_indices = @transform_11, window_bounds = array<i64: 64, 32>}, {pipeline_mode = #tpu.pipeline_mode<synchronous>, transform_indices = @transform_12, window_bounds = array<i64: 1, 32>}, {pipeline_mode = #tpu.pipeline_mode<synchronous>, transform_indices = @transform_13, window_bounds = array<i64: 1, 32>}, {pipeline_mode = #tpu.pipeline_mode<synchronous>, transform_indices = @transform_14, window_bounds = array<i64: 1, 32>}, {pipeline_mode = #tpu.pipeline_mode<synchronous>, transform_indices = @transform_15, window_bounds = array<i64: 1, 32>}, {pipeline_mode = #tpu.pipeline_mode<synchronous>, transform_indices = @transform_16, window_bounds = array<i64: 1, 32>}, {transform_indices = @transform_17, window_bounds = array<i64: 8, 32>}]} {
    %c0 = arith.constant 0 : index
    %c0_0 = arith.constant 0 : index
    %0 = vector.load %arg1[%c0, %c0_0] : memref<8x32xf32, #tpu.memory_space<vmem>>, vector<8x32xf32>
    %c0_1 = arith.constant 0 : index
    %c0_2 = arith.constant 0 : index
    %1 = vector.load %arg2[%c0_1, %c0_2] : memref<32x32xf32, #tpu.memory_space<vmem>>, vector<32x32xf32>
    %cst = arith.constant dense<0.000000e+00> : vector<8x32xf32>
    %2 = tpu.matmul %0, %1, %cst {dimension_numbers = #tpu.dot_dimension_numbers<[1], [0], [0], [1], [0, 0, 1, 1], [], []>} : vector<8x32xf32>, vector<32x32xf32>, vector<8x32xf32> -> vector<8x32xf32>
    %c0_3 = arith.constant 0 : index
    %c0_4 = arith.constant 0 : index
    %3 = vector.load %arg3[%c0_3, %c0_4] : memref<1x32xf32, #tpu.memory_space<vmem>>, vector<1x32xf32>
    %4 = vector.broadcast %3 : vector<1x32xf32> to vector<8x32xf32>
    %5 = arith.addf %2, %4 : vector<8x32xf32>
    %cst_5 = arith.constant 0.000000e+00 : f32
    %6 = vector.broadcast %cst_5 : f32 to vector<8x32xf32>
    %7 = arith.cmpf ogt, %5, %6 : vector<8x32xf32>
    %cst_6 = arith.constant 1.000000e+00 : f32
    %8 = vector.broadcast %cst_6 : f32 to vector<8x32xf32>
    %9 = arith.addf %5, %8 : vector<8x32xf32>
    %10 = math.exp %5 : vector<8x32xf32>
    %11 = arith.select %7, %9, %10 : vector<8x32xi1>, vector<8x32xf32>
    %c0_7 = arith.constant 0 : index
    %c0_8 = arith.constant 0 : index
    %12 = vector.load %arg4[%c0_7, %c0_8] : memref<32x32xf32, #tpu.memory_space<vmem>>, vector<32x32xf32>
    %cst_9 = arith.constant dense<0.000000e+00> : vector<8x32xf32>
    %13 = tpu.matmul %0, %12, %cst_9 {dimension_numbers = #tpu.dot_dimension_numbers<[1], [0], [0], [1], [0, 0, 1, 1], [], []>} : vector<8x32xf32>, vector<32x32xf32>, vector<8x32xf32> -> vector<8x32xf32>
    %c0_10 = arith.constant 0 : index
    %c0_11 = arith.constant 0 : index
    %14 = vector.load %arg5[%c0_10, %c0_11] : memref<1x32xf32, #tpu.memory_space<vmem>>, vector<1x32xf32>
    %15 = vector.broadcast %14 : vector<1x32xf32> to vector<8x32xf32>
    %16 = arith.addf %13, %15 : vector<8x32xf32>
    %cst_12 = arith.constant 0.000000e+00 : f32
    %17 = vector.broadcast %cst_12 : f32 to vector<8x32xf32>
    %18 = arith.cmpf ogt, %16, %17 : vector<8x32xf32>
    %cst_13 = arith.constant 1.000000e+00 : f32
    %19 = vector.broadcast %cst_13 : f32 to vector<8x32xf32>
    %20 = arith.addf %16, %19 : vector<8x32xf32>
    %21 = math.exp %16 : vector<8x32xf32>
    %22 = arith.select %18, %20, %21 : vector<8x32xi1>, vector<8x32xf32>
    %c0_14 = arith.constant 0 : index
    %c0_15 = arith.constant 0 : index
    %23 = vector.load %arg6[%c0_14, %c0_15] : memref<32x32xf32, #tpu.memory_space<vmem>>, vector<32x32xf32>
    %cst_16 = arith.constant dense<0.000000e+00> : vector<8x32xf32>
    %24 = tpu.matmul %0, %23, %cst_16 {dimension_numbers = #tpu.dot_dimension_numbers<[1], [0], [0], [1], [0, 0, 1, 1], [], []>} : vector<8x32xf32>, vector<32x32xf32>, vector<8x32xf32> -> vector<8x32xf32>
    %c0_17 = arith.constant 0 : index
    %c0_18 = arith.constant 0 : index
    %25 = vector.load %arg7[%c0_17, %c0_18] : memref<1x32xf32, #tpu.memory_space<vmem>>, vector<1x32xf32>
    %26 = vector.broadcast %25 : vector<1x32xf32> to vector<8x32xf32>
    %27 = arith.addf %24, %26 : vector<8x32xf32>
    %cst_19 = arith.constant dense<0.000000e+00> : vector<32x32xf32>
    %28 = tpu.matmul %22, %27, %cst_19 {dimension_numbers = #tpu.dot_dimension_numbers<[0], [0], [1], [1], [0, 1, 1, 1], [], []>} : vector<8x32xf32>, vector<8x32xf32>, vector<32x32xf32> -> vector<32x32xf32>
    %cst_20 = arith.constant dense<0.000000e+00> : vector<8x32xf32>
    %29 = tpu.matmul %11, %28, %cst_20 {dimension_numbers = #tpu.dot_dimension_numbers<[1], [0], [0], [1], [0, 0, 1, 1], [], []>} : vector<8x32xf32>, vector<32x32xf32>, vector<8x32xf32> -> vector<8x32xf32>
    %c0_21 = arith.constant 0 : index
    %c0_22 = arith.constant 0 : index
    %30 = vector.load %arg8[%c0_21, %c0_22] : memref<32x32xf32, #tpu.memory_space<vmem>>, vector<32x32xf32>
    %cst_23 = arith.constant dense<0.000000e+00> : vector<8x32xf32>
    %31 = tpu.matmul %29, %30, %cst_23 {dimension_numbers = #tpu.dot_dimension_numbers<[1], [0], [0], [1], [0, 0, 1, 1], [], []>} : vector<8x32xf32>, vector<32x32xf32>, vector<8x32xf32> -> vector<8x32xf32>
    %c0_24 = arith.constant 0 : index
    %c0_25 = arith.constant 0 : index
    %32 = vector.load %arg9[%c0_24, %c0_25] : memref<1x32xf32, #tpu.memory_space<vmem>>, vector<1x32xf32>
    %33 = vector.broadcast %32 : vector<1x32xf32> to vector<8x32xf32>
    %34 = arith.addf %31, %33 : vector<8x32xf32>
    %35 = arith.addf %0, %34 : vector<8x32xf32>
    %c0_26 = arith.constant 0 : index
    %c0_27 = arith.constant 0 : index
    %36 = vector.load %arg14[%c0_26, %c0_27] : memref<1x32xf32, #tpu.memory_space<vmem>>, vector<1x32xf32>
    %c0_28 = arith.constant 0 : index
    %c0_29 = arith.constant 0 : index
    %37 = vector.load %arg15[%c0_28, %c0_29] : memref<1x32xf32, #tpu.memory_space<vmem>>, vector<1x32xf32>
    %cst_30 = arith.constant dense<0.000000e+00> : vector<8xf32>
    %38 = vector.multi_reduction <add>, %35, %cst_30 [1] : vector<8x32xf32> to vector<8xf32>
    %39 = vector.shape_cast %38 : vector<8xf32> to vector<8x1xf32>
    %cst_31 = arith.constant 3.200000e+01 : f32
    %40 = vector.broadcast %cst_31 : f32 to vector<8x1xf32>
    %41 = arith.divf %39, %40 : vector<8x1xf32>
    %42 = vector.broadcast %41 : vector<8x1xf32> to vector<8x32xf32>
    %43 = arith.subf %35, %42 : vector<8x32xf32>
    %44 = arith.mulf %43, %43 : vector<8x32xf32>
    %cst_32 = arith.constant dense<0.000000e+00> : vector<8xf32>
    %45 = vector.multi_reduction <add>, %44, %cst_32 [1] : vector<8x32xf32> to vector<8xf32>
    %46 = vector.shape_cast %45 : vector<8xf32> to vector<8x1xf32>
    %cst_33 = arith.constant 3.200000e+01 : f32
    %47 = vector.broadcast %cst_33 : f32 to vector<8x1xf32>
    %48 = arith.divf %46, %47 : vector<8x1xf32>
    %49 = vector.broadcast %41 : vector<8x1xf32> to vector<8x32xf32>
    %50 = arith.subf %35, %49 : vector<8x32xf32>
    %cst_34 = arith.constant 9.99999974E-6 : f32
    %51 = vector.broadcast %cst_34 : f32 to vector<8x1xf32>
    %52 = arith.addf %48, %51 : vector<8x1xf32>
    %53 = math.rsqrt %52 : vector<8x1xf32>
    %54 = vector.broadcast %53 : vector<8x1xf32> to vector<8x32xf32>
    %55 = arith.mulf %50, %54 : vector<8x32xf32>
    %56 = vector.broadcast %36 : vector<1x32xf32> to vector<8x32xf32>
    %57 = arith.mulf %55, %56 : vector<8x32xf32>
    %58 = vector.broadcast %37 : vector<1x32xf32> to vector<8x32xf32>
    %59 = arith.addf %57, %58 : vector<8x32xf32>
    %c0_35 = arith.constant 0 : index
    %c0_36 = arith.constant 0 : index
    %60 = vector.load %arg10[%c0_35, %c0_36] : memref<32x64xf32, #tpu.memory_space<vmem>>, vector<32x64xf32>
    %cst_37 = arith.constant dense<0.000000e+00> : vector<8x64xf32>
    %61 = tpu.matmul %59, %60, %cst_37 {dimension_numbers = #tpu.dot_dimension_numbers<[1], [0], [0], [1], [0, 0, 1, 1], [], []>} : vector<8x32xf32>, vector<32x64xf32>, vector<8x64xf32> -> vector<8x64xf32>
    %c0_38 = arith.constant 0 : index
    %c0_39 = arith.constant 0 : index
    %62 = vector.load %arg11[%c0_38, %c0_39] : memref<1x64xf32, #tpu.memory_space<vmem>>, vector<1x64xf32>
    %63 = vector.broadcast %62 : vector<1x64xf32> to vector<8x64xf32>
    %64 = arith.addf %61, %63 : vector<8x64xf32>
    %cst_40 = arith.constant 0.000000e+00 : f32
    %65 = vector.broadcast %cst_40 : f32 to vector<8x64xf32>
    %66 = arith.maximumf %64, %65 : vector<8x64xf32>
    %c0_41 = arith.constant 0 : index
    %c0_42 = arith.constant 0 : index
    %67 = vector.load %arg12[%c0_41, %c0_42] : memref<64x32xf32, #tpu.memory_space<vmem>>, vector<64x32xf32>
    %cst_43 = arith.constant dense<0.000000e+00> : vector<8x32xf32>
    %68 = tpu.matmul %66, %67, %cst_43 {dimension_numbers = #tpu.dot_dimension_numbers<[1], [0], [0], [1], [0, 0, 1, 1], [], []>} : vector<8x64xf32>, vector<64x32xf32>, vector<8x32xf32> -> vector<8x32xf32>
    %c0_44 = arith.constant 0 : index
    %c0_45 = arith.constant 0 : index
    %69 = vector.load %arg13[%c0_44, %c0_45] : memref<1x32xf32, #tpu.memory_space<vmem>>, vector<1x32xf32>
    %70 = vector.broadcast %69 : vector<1x32xf32> to vector<8x32xf32>
    %71 = arith.addf %68, %70 : vector<8x32xf32>
    %72 = arith.addf %59, %71 : vector<8x32xf32>
    %c0_46 = arith.constant 0 : index
    %c0_47 = arith.constant 0 : index
    %73 = vector.load %arg16[%c0_46, %c0_47] : memref<1x32xf32, #tpu.memory_space<vmem>>, vector<1x32xf32>
    %c0_48 = arith.constant 0 : index
    %c0_49 = arith.constant 0 : index
    %74 = vector.load %arg17[%c0_48, %c0_49] : memref<1x32xf32, #tpu.memory_space<vmem>>, vector<1x32xf32>
    %cst_50 = arith.constant dense<0.000000e+00> : vector<8xf32>
    %75 = vector.multi_reduction <add>, %72, %cst_50 [1] : vector<8x32xf32> to vector<8xf32>
    %76 = vector.shape_cast %75 : vector<8xf32> to vector<8x1xf32>
    %cst_51 = arith.constant 3.200000e+01 : f32
    %77 = vector.broadcast %cst_51 : f32 to vector<8x1xf32>
    %78 = arith.divf %76, %77 : vector<8x1xf32>
    %79 = vector.broadcast %78 : vector<8x1xf32> to vector<8x32xf32>
    %80 = arith.subf %72, %79 : vector<8x32xf32>
    %81 = arith.mulf %80, %80 : vector<8x32xf32>
    %cst_52 = arith.constant dense<0.000000e+00> : vector<8xf32>
    %82 = vector.multi_reduction <add>, %81, %cst_52 [1] : vector<8x32xf32> to vector<8xf32>
    %83 = vector.shape_cast %82 : vector<8xf32> to vector<8x1xf32>
    %cst_53 = arith.constant 3.200000e+01 : f32
    %84 = vector.broadcast %cst_53 : f32 to vector<8x1xf32>
    %85 = arith.divf %83, %84 : vector<8x1xf32>
    %86 = vector.broadcast %78 : vector<8x1xf32> to vector<8x32xf32>
    %87 = arith.subf %72, %86 : vector<8x32xf32>
    %cst_54 = arith.constant 9.99999974E-6 : f32
    %88 = vector.broadcast %cst_54 : f32 to vector<8x1xf32>
    %89 = arith.addf %85, %88 : vector<8x1xf32>
    %90 = math.rsqrt %89 : vector<8x1xf32>
    %91 = vector.broadcast %90 : vector<8x1xf32> to vector<8x32xf32>
    %92 = arith.mulf %87, %91 : vector<8x32xf32>
    %93 = vector.broadcast %73 : vector<1x32xf32> to vector<8x32xf32>
    %94 = arith.mulf %92, %93 : vector<8x32xf32>
    %95 = vector.broadcast %74 : vector<1x32xf32> to vector<8x32xf32>
    %96 = arith.addf %94, %95 : vector<8x32xf32>
    %c0_55 = arith.constant 0 : index
    %c0_56 = arith.constant 0 : index
    %97 = vector.load %arg18[%c0_55, %c0_56] : memref<8x32xf32, #tpu.memory_space<vmem>>, vector<8x32xf32>
    tpu.vector_store %arg18[%c0_55, %c0_56], %96 {strides = array<i32>} : memref<8x32xf32, #tpu.memory_space<vmem>>, vector<8x32xf32>,
    return
  }
  func.func @transform_0(%arg0: i32) -> (i32, i32) {
    %c0_i32 = arith.constant 0 : i32
    %c0_i32_0 = arith.constant 0 : i32
    return %arg0, %c0_i32 : i32, i32
  }
  func.func @transform_1(%arg0: i32) -> (i32, i32) {
    %c0_i32 = arith.constant 0 : i32
    %c0_i32_0 = arith.constant 0 : i32
    %c0_i32_1 = arith.constant 0 : i32
    return %c0_i32, %c0_i32_0 : i32, i32
  }
  func.func @transform_2(%arg0: i32) -> (i32, i32) {
    %c0_i32 = arith.constant 0 : i32
    %c0_i32_0 = arith.constant 0 : i32
    %c0_i32_1 = arith.constant 0 : i32
    return %c0_i32, %c0_i32_0 : i32, i32
  }
  func.func @transform_3(%arg0: i32) -> (i32, i32) {
    %c0_i32 = arith.constant 0 : i32
    %c0_i32_0 = arith.constant 0 : i32
    %c0_i32_1 = arith.constant 0 : i32
    return %c0_i32, %c0_i32_0 : i32, i32
  }
  func.func @transform_4(%arg0: i32) -> (i32, i32) {
    %c0_i32 = arith.constant 0 : i32
    %c0_i32_0 = arith.constant 0 : i32
    %c0_i32_1 = arith.constant 0 : i32
    return %c0_i32, %c0_i32_0 : i32, i32
  }
  func.func @transform_5(%arg0: i32) -> (i32, i32) {
    %c0_i32 = arith.constant 0 : i32
    %c0_i32_0 = arith.constant 0 : i32
    %c0_i32_1 = arith.constant 0 : i32
    return %c0_i32, %c0_i32_0 : i32, i32
  }
  func.func @transform_6(%arg0: i32) -> (i32, i32) {
    %c0_i32 = arith.constant 0 : i32
    %c0_i32_0 = arith.constant 0 : i32
    %c0_i32_1 = arith.constant 0 : i32
    return %c0_i32, %c0_i32_0 : i32, i32
  }
  func.func @transform_7(%arg0: i32) -> (i32, i32) {
    %c0_i32 = arith.constant 0 : i32
    %c0_i32_0 = arith.constant 0 : i32
    %c0_i32_1 = arith.constant 0 : i32
    return %c0_i32, %c0_i32_0 : i32, i32
  }
  func.func @transform_8(%arg0: i32) -> (i32, i32) {
    %c0_i32 = arith.constant 0 : i32
    %c0_i32_0 = arith.constant 0 : i32
    %c0_i32_1 = arith.constant 0 : i32
    return %c0_i32, %c0_i32_0 : i32, i32
  }
  func.func @transform_9(%arg0: i32) -> (i32, i32) {
    %c0_i32 = arith.constant 0 : i32
    %c0_i32_0 = arith.constant 0 : i32
    %c0_i32_1 = arith.constant 0 : i32
    return %c0_i32, %c0_i32_0 : i32, i32
  }
  func.func @transform_10(%arg0: i32) -> (i32, i32) {
    %c0_i32 = arith.constant 0 : i32
    %c0_i32_0 = arith.constant 0 : i32
    %c0_i32_1 = arith.constant 0 : i32
    return %c0_i32, %c0_i32_0 : i32, i32
  }
  func.func @transform_11(%arg0: i32) -> (i32, i32) {
    %c0_i32 = arith.constant 0 : i32
    %c0_i32_0 = arith.constant 0 : i32
    %c0_i32_1 = arith.constant 0 : i32
    return %c0_i32, %c0_i32_0 : i32, i32
  }
  func.func @transform_12(%arg0: i32) -> (i32, i32) {
    %c0_i32 = arith.constant 0 : i32
    %c0_i32_0 = arith.constant 0 : i32
    %c0_i32_1 = arith.constant 0 : i32
    return %c0_i32, %c0_i32_0 : i32, i32
  }
  func.func @transform_13(%arg0: i32) -> (i32, i32) {
    %c0_i32 = arith.constant 0 : i32
    %c0_i32_0 = arith.constant 0 : i32
    %c0_i32_1 = arith.constant 0 : i32
    return %c0_i32, %c0_i32_0 : i32, i32
  }
  func.func @transform_14(%arg0: i32) -> (i32, i32) {
    %c0_i32 = arith.constant 0 : i32
    %c0_i32_0 = arith.constant 0 : i32
    %c0_i32_1 = arith.constant 0 : i32
    return %c0_i32, %c0_i32_0 : i32, i32
  }
  func.func @transform_15(%arg0: i32) -> (i32, i32) {
    %c0_i32 = arith.constant 0 : i32
    %c0_i32_0 = arith.constant 0 : i32
    %c0_i32_1 = arith.constant 0 : i32
    return %c0_i32, %c0_i32_0 : i32, i32
  }
  func.func @transform_16(%arg0: i32) -> (i32, i32) {
    %c0_i32 = arith.constant 0 : i32
    %c0_i32_0 = arith.constant 0 : i32
    %c0_i32_1 = arith.constant 0 : i32
    return %c0_i32, %c0_i32_0 : i32, i32
  }
  func.func @transform_17(%arg0: i32) -> (i32, i32) {
    %c0_i32 = arith.constant 0 : i32
    %c0_i32_0 = arith.constant 0 : i32
    return %arg0, %c0_i32 : i32, i32
  }
}

</mosaic_0001>

<bundles_post_ra>
// kernel: tpu_custom_call.1
= control target key start
LH: loop header
LB: loop body
LE: loop exit
PB: predicated region body
PF: predicated region fallthrough
CT: control target
= control target key end

     0   :  { %s2300_s0 = inlined_call_operand.hbm [shape: f32[16,32], index: 0, kind: input, shape index: {}]   ;;  %s2301_s1 = inlined_call_operand.vmem [shape: f32[32,32], index: 1, kind: input, shape index: {}]   ;;  %s2302_s2 = inlined_call_operand.vmem [shape: f32[1,32], index: 2, kind: input, shape index: {}]   ;;  %s2303_s3 = inlined_call_operand.vmem [shape: f32[32,32], index: 3, kind: input, shape index: {}]   ;;  %s2304_s4 = inlined_call_operand.vmem [shape: f32[1,32], index: 4, kind: input, shape index: {}]   ;;  %s2305_s5 = inlined_call_operand.vmem [shape: f32[32,32], index: 5, kind: input, shape index: {}]   ;;  %s2306_s6 = inlined_call_operand.vmem [shape: f32[1,32], index: 6, kind: input, shape index: {}]   ;;  %s2307_s7 = inlined_call_operand.hbm [shape: f32[32,32], index: 7, kind: input, shape index: {}]   ;;  %s2308_s8 = inlined_call_operand.vmem [shape: f32[1,32], index: 8, kind: input, shape index: {}]   ;;  %s2309_s9 = inlined_call_operand.hbm [shape: f32[32,64], index: 9, kind: input, shape index: {}]   ;;  %s2310_s10 = inlined_call_operand.vmem [shape: f32[1,64], index: 10, kind: input, shape index: {}]   ;;  %s2311_s11 = inlined_call_operand.vmem [shape: f32[64,32], index: 11, kind: input, shape index: {}]   ;;  %s2312_s12 = inlined_call_operand.vmem [shape: f32[1,32], index: 12, kind: input, shape index: {}]   ;;  %s2313_s13 = inlined_call_operand.vmem [shape: f32[1,32], index: 13, kind: input, shape index: {}]   ;;  %s2314_s14 = inlined_call_operand.vmem [shape: f32[1,32], index: 14, kind: input, shape index: {}]   ;;  %s2315_s15 = inlined_call_operand.vmem [shape: f32[1,32], index: 15, kind: input, shape index: {}]   ;;  %s2316_s16 = inlined_call_operand.vmem [shape: f32[1,32], index: 16, kind: input, shape index: {}]   ;;  %s2317_s17 = inlined_call_operand.hbm [shape: f32[16,32], index: 17, kind: output, shape index: {}]  }
   0x1   :  { %2332 = sst [smem:[#allocation18_spill]] %s2300_s0 }
   0x2   :  { %2333 = sst [smem:[#allocation19_spill]] %s2301_s1 }
   0x3   :  { %2334 = sst [smem:[#allocation20_spill]] %s2307_s7 }
   0x4   :  { %2335 = sst [smem:[#allocation21_spill]] %s2309_s9 }
   0x5   :  { %2336 = sst [smem:[#allocation22_spill]] %s2315_s15 }
   0x6   :  { %2337 = sst [smem:[#allocation23_spill]] %s2316_s16 }
   0x7   :  { %2338 = sst [smem:[#allocation24_spill]] %s2317_s17 }
   0x8   :  { %22 = vsyncpa [#allocation3], 0 }
   0x9   :  { %24 = vsyncpa [#allocation3 + $0x1], 0 }
   0xa   :  { %25 = vsyncpa [#allocation6], 0 }
   0xb   :  { %26 = vsyncpa [#allocation4], 0 }
   0xc   :  { %28 = vsyncpa [#allocation4 + $0x1], 0  ;;  %s1978_s24 = smov 0   ;;  %s1980_s25 = smov 0  }
   0xd   :  { %s1982_s26 = smov 0   ;;  %s1984_s27 = smov 0  }
   0xe LB: > { %2339 = sst [smem:[#allocation12_spill]] %s1866_s24  ;;  %s1999_s28 = sadd.s32 4294967295, %s1878_s27   ;;  %s1878_s27 = sphi %s1984_s27, %s2370_s27   ;;  %s1874_s26 = sphi %s1982_s26, %s2372_s26   ;;  %s1870_s25 = sphi %s1980_s25, %s2374_s25   ;;  %s1866_s24 = sphi %s1978_s24, %s2373_s24  }
   0xf   : > { %2340 = sst [smem:[#allocation13_spill]] %s1874_s26  ;;  %s1477_s29 = sadd.s32 4294967294, %s1878_s27  }
  0x10   : > { %2341 = sst [smem:[#allocation14_spill]] %s1878_s27  ;;  %p54_p0 = scmp.ne.s32.totalorder %s1870_s25, %s1866_s24 }
  0x11   : > { %p2322_p1 = scmp.eq.s32.totalorder %s1999_s28, 0  ;;  %p420_p3 = scmp.eq.s32.totalorder %s1477_s29, 1 }
  0x12   : > { %p1478_p5 = scmp.ge.s32.totalorder %s1878_s27, 1  ;;  %p427_p7 = scmp.lt.s32.totalorder %s1878_s27, 3 }
  0x13   : > { %p2008_p4 = por %p2322_p1, %p54_p0  ;;  %p2013_p6 = por %p420_p3, %p54_p0 }
  0x14   : > { %p2018_p8 = pnand %p1478_p5, %p427_p7  ;;  %s1880_s19 = smov [#allocation5]  }
  0x15   : > { %s2342_s0 = scalar_select %p2008_p4, 1, 0 }
  0x16   : > { %s2343_s30 = scalar_select %p2013_p6, 1, 0 }
  0x17   : > { %s2345_s18 = scalar_select %p2018_p8, 1, 0 }
  0x18   : > { %2344 = sst [smem:[#allocation15_spill]] %s2343_s30  ;;  %s457_s1 = sshll.u32 %s1880_s19, 4  ;;  %s458_s1 = int_to_ptr.vmem [resolvable:$true] %s457_s1 }
  0x19   : > { %p1663_p9 = pneg %p2018_p8  ;;  %s1881_s21 = smov [#allocation7]  }
  0x1a   : > { %s473_s22 = sshll.u32 %s1881_s21, 4  ;;  %s1741_s23 = scalar_lea.vmem %s458_s1, 512  ;;  %s474_s22 = int_to_ptr.vmem [resolvable:$true] %s473_s22 }
  0x1b   : > { %p2027_p11 = pnand %p1663_p9, %p2322_p1  ;;  %p1742_p13 = scmp.ne.s32.totalorder %s458_s1, %s1741_s23 }
  0x1c   : > { %p1749_p5 = scmp.lt.s32.totalorder %s458_s1, %s458_s1  ;;  %p1750_p7 = scmp.lt.s32.totalorder %s1741_s23, %s1741_s23 }
  0x1d   : > { %p1732_p12 = pneg %p2027_p11 }
  0x1e   : > { %p1751_p10 = por %p1750_p7, %p1749_p5 }
  0x1f   : > { %p1744_p0 = pnand %p1742_p13, %p1732_p12 }
  0x21   : > { %p1745_p3 = pneg %p1744_p0 }
  0x23   : > { %p1752_p9 = pnand %p1751_p10, %p1745_p3 }
  0x25   : > { %1755 = shalt.err (!%p1752_p9)
}
  0x26   : > { %s1882_s29 = smov 128   ;;  %s1883_s19 = smov 8  }
  0x27   : > { %s2347_s7 = sld [smem:[#allocation20_spill]]  ;;  %s1767_s24 = scalar_lea.vmem %s474_s22, 512 }
  0x28   : > { %p1768_p1 = scmp.ne.s32.totalorder %s474_s22, %s1767_s24  ;;  %p1775_p2 = scmp.lt.s32.totalorder %s474_s22, %s474_s22 }
  0x29   : > { %p1776_p6 = scmp.lt.s32.totalorder %s1767_s24, %s1767_s24 }
  0x2a   : > { %p1770_p13 = pnand %p1768_p1, %p1732_p12 }
  0x2b   : > { %p1777_p5 = por %p1776_p6, %p1775_p2 }
  0x2c   : > { %p1771_p0 = pneg %p1770_p13 }
  0x2d   : > { %1666 = dma.hbm_to_vmem [thread:$0]  (!%p2027_p11), %s2347_s7, 512, %s458_s1, [#allocation6], %s1882_s29, %s1882_s29, %s1883_s19  }
  0x2e   : > { %p1778_p10 = pnand %p1777_p5, %p1771_p0 }
  0x30   : > { %1781 = shalt.err (!%p1778_p10)
}
  0x31   : > { %s2348_s9 = sld [smem:[#allocation21_spill]]  ;;  %s2050_s24 = sadd.s32 1, %s1878_s27  }
  0x32   : > { %2349 = sst [smem:[#allocation16_spill]] %s2050_s24  ;;  %s41_s30 = sadd.s32 1, %s1874_s26 }
  0x33   : > { %s38_s1 = ssub.s32 %s1878_s27, %s2050_s24  ;;  %p48_p1 = scmp.ne.s32.totalorder %s1874_s26, %s1870_s25 }
  0x34   : > { %p39_p2 = scmp.eq.s32.totalorder %s38_s1, 0  ;;  %p49_p6 = scmp.eq.s32.totalorder %s1878_s27, 0 }
  0x35   : > { %p2350_p12 = scmp.eq.s32.totalorder %s1999_s28, 1  ;;  %p1680_p7 = scmp.lt.s32.totalorder %s1878_s27, 2 }
  0x36   : > { %s2066_s20 = scalar_select %p39_p2, %s1874_s26, %s41_s30  }
  0x37   : > { %1669 = dma.hbm_to_vmem [thread:$0]  (!%p2027_p11), %s2348_s9, 512, %s474_s22, [#allocation6], %s1882_s29, %s1882_s29, %s1883_s19  }
  0x38   : > { %p2060_p3 = por %p2350_p12, %p48_p1  ;;  %2352 = sst [smem:[#allocation17_spill]] %s2066_s20 }
  0x39   : > { %p50_p9 = por %p49_p6, %p48_p1  ;;  %s508_s21 = sand.u32 1, %s1874_s26  }
  0x3a   : > { %s2351_s17 = scalar_select %p2060_p3, 1, 0 }
  0x3b   : > { %s1482_s23 = sshll.u32 %s508_s21, 3  ;;  %s1483_s22 = sshll.u32 %s1878_s27, 7 }
  0x3c   : > { %s2353_s7 = sld [smem:[#allocation18_spill]]  ;;  %s512_s1 = scalar_lea.vmem [#allocation2], %s1482_s23 }
  0x3d   : > { %s519_s24 = sshll.u32 %s512_s1, 4  ;;  %p2075_p11 = pnand %p1680_p7, %p50_p9  ;;  %s520_s24 = int_to_ptr.vmem [resolvable:$true] %s519_s24 }
  0x3e   : > { %s509_s30 = scalar_lea.sflag [#allocation3], %s508_s21 }
  0x3f   : > { %p1784_p0 = pneg %p2075_p11 }
  0x42   : > { %s2073_s9 = scalar_lea.hbm %s2353_s7, %s1483_s22  ;;  %s1787_s19 = scalar_lea.hbm %s2353_s7, 256 }
  0x43   : > { %s1782_s20 = scalar_lea.hbm %s2073_s9, 128  ;;  %p1788_p1 = scmp.lt.s32.totalorder %s2073_s9, %s2353_s7 }
  0x44   : > { %p1783_p13 = scmp.ne.s32.totalorder %s2073_s9, %s1782_s20  ;;  %p1789_p2 = scmp.lt.s32.totalorder %s1787_s19, %s1782_s20 }
  0x46   : > { %p1785_p5 = pnand %p1784_p0, %p1783_p13  ;;  %p1790_p6 = por %p1789_p2, %p1788_p1 }
  0x48   : > { %p1786_p10 = pneg %p1785_p5 }
  0x4a   : > { %p1791_p12 = pnand %p1790_p6, %p1786_p10 }
  0x4c   : > { %1794 = shalt.err (!%p1791_p12)
}
  0x4d   : > { %s1795_s1 = scalar_lea.vmem %s520_s24, 128  ;;  %s1884_s21 = smov [#allocation2]  }
  0x4e   : > { %p1796_p7 = scmp.ne.s32.totalorder %s520_s24, %s1795_s1  ;;  %s1800_s27 = sshll.u32 %s1884_s21, 4  ;;  %s1801_s27 = int_to_ptr.vmem [resolvable:$false] %s1800_s27 }
  0x4f   : > { %s1802_s15 = scalar_lea.vmem %s1801_s27, 256  ;;  %p1803_p13 = scmp.lt.s32.totalorder %s520_s24, %s1801_s27 }
  0x50   : > { %p1798_p9 = pnand %p1796_p7, %p1784_p0  ;;  %p1804_p5 = scmp.lt.s32.totalorder %s1802_s15, %s1795_s1 }
  0x52   : > { %p1799_p3 = pneg %p1798_p9  ;;  %p1805_p4 = por %p1804_p5, %p1803_p13 }
  0x54   : > { %p1806_p8 = pnand %p1805_p4, %p1799_p3 }
  0x56   : > { %1809 = shalt.err (!%p1806_p8)
}
  0x57   : > { %1673 = dma.hbm_to_vmem [thread:$0]  (!%p2075_p11), %s2073_s9, 128, %s520_s24, %s509_s30  }
  0x58   : > { %p2355_p10 = scmp.ne.s32.totalorder %s2345_s18, 0 }
  0x59   : > { %s2096_s26 = sand.u32 (!%p2355_p10), 1, %s1870_s25   ;;  %p2356_p4 = scmp.ne.s32.totalorder (!%p2355_p10), %s2342_s0, 0 }
  0x5a   : > { %528 = sbr.rel (%p2355_p10) target bundleno = 2083 (0x823), region = 88  ;;  %s1485_s20 = sshll.u32 (!%p2355_p10), %s2096_s26, 3 }
  0x5b   : > { %s531_s27 = scalar_lea.sflag (!%p2355_p10), [#allocation3], %s2096_s26  ;;  %s534_s15 = scalar_lea.vmem (!%p2355_p10), [#allocation2], %s1485_s20 }
  0x5f   : > { %1853 = dma.done.wait (%p2356_p4), %s531_s27, 128  }
  0x60   : > { %1855 = vsyncadd (%p2356_p4), %s531_s27, 4294967168  ;;  %p2357_p8 = scmp.eq.s32.totalorder %s1999_s28, 0 }
  0x62   : > { %1857 = dma.done.wait (%p2357_p8), [#allocation6], 1024   ;;  %p2358_p3 = pmov %p2357_p8 }
  0x63   : > { %v1885_v0 = vmov 0.0   ;;  %vm1886_vm0 = vmmov 0   ;;  %s2359_s0 = sld [smem:[#allocation19_spill]]  ;;  %v773_v4 = vld [vmem:[%s2305_s5 + $0x18] sm:$0xff]  ;;  %v772_v5 = vld [vmem:[%s2305_s5 + $0x10] sm:$0xff]  ;;  %v2136_v7 = vld [vmem:[%s534_s15] sm:$0xff] }
  0x64   : > { %1859 = vsyncadd (%p2358_p3), [#allocation6], 4294966272  ;;  %1558 = vmatprep.subr.mxu1 %v1885_v0  ;;  %1566 = vmatprep.mubr.msk.f32.mxu1 %vm1886_vm0, %v1885_v0  ;;  %vm605_vm1 = vcmask 261120   ;;  %v687_v8 = vld [vmem:[%s2303_s3 + $0x18] sm:$0xff]  ;;  %v771_v9 = vld [vmem:[%s2305_s5 + $0x8] sm:$0xff]  ;;  %vm883_vm3 = vcmask 64512  }
  0x65   : > { %1580 = vmatprep.subr.mxu0 %v1885_v0  ;;  %1588 = vmatprep.mubr.msk.f32.mxu0 %vm1886_vm0, %v1885_v0  ;;  %v686_v10 = vld [vmem:[%s2303_s3 + $0x10] sm:$0xff]  ;;  %v770_v11 = vld [vmem:[%s2305_s5] sm:$0xff]  ;;  %v685_v12 = vld [vmem:[%s2303_s3 + $0x8] sm:$0xff]  ;;  %vm1269_vm5 = vcmask 523264   ;;  %s2360_s29 = sld [smem:[#allocation22_spill]]  ;;  %s1511_s21 = sshll.u32 %s1999_s28, 7 }
  0x66   : > { %1581 = vmatpush3.msra.mxu0 %v773_v4  ;;  %v684_v13 = vld [vmem:[%s2303_s3] sm:$0xff]  ;;  %v1057_v32 = vld [vmem:[#allocation5 + $0x18] sm:$0xff]  ;;  %v1055_v34 = vld [vmem:[#allocation5 + $0x8] sm:$0xff]  ;;  %s2361_s1 = sld [smem:[#allocation23_spill]]  ;;  %s592_s27 = scalar_lea.vmem [#allocation8], %s1485_s20 }
  0x67   : > { %1582 = vmatprep.subr.mxu0 %v1885_v0  ;;  %v1493_v16 = vld [vmem:[%s2306_s6] ss:$0 sm:$0xff]  ;;  %v1054_v45 = vld [vmem:[#allocation5] sm:$0xff]  ;;  %v1172_v59 = vld [vmem:[#allocation7 + $0x18] sm:$0xff]  ;;  %s1388_s9 = sshll.u32 %s592_s27, 4  ;;  %s2362_s24 = sld [smem:[#allocation24_spill]]  ;;  %s1389_s9 = int_to_ptr.vmem [resolvable:$true] %s1388_s9 }
  0x68   : > { %1583 = vmatpush3.msra.mxu0 %v772_v5  ;;  %v1491_v18 = vld [vmem:[%s2304_s4] ss:$0 sm:$0xff]  ;;  %v1170_v61 = vld [vmem:[#allocation7 + $0x8] sm:$0xff]  ;;  %v1169_v62 = vld [vmem:[#allocation7] sm:$0xff]  ;;  %s1375_s30 = scalar_lea.sflag [#allocation4], %s2096_s26  ;;  %s1810_s22 = scalar_lea.vmem %s1389_s9, 128 }
  0x69   : > { %v597_v1 = vld [vmem:[%s2359_s0 + $0x18] sm:$0xff]  ;;  %v596_v2 = vld [vmem:[%s2359_s0 + $0x10] sm:$0xff]  ;;  %v595_v3 = vld [vmem:[%s2359_s0 + $0x8] sm:$0xff]  ;;  %1584 = vmatprep.subr.mxu0 %v1885_v0  ;;  %p1811_p11 = scmp.ne.s32.totalorder %s1389_s9, %s1810_s22  ;;  %p2364_p0 = scmp.ne.s32.totalorder %s2351_s17, 0 }
  0x6a   : > { %1559 = vmatpush3.msra.mxu1 %v597_v1  ;;  %v594_v6 = vld [vmem:[%s2359_s0] sm:$0xff]  ;;  %1585 = vmatpush3.msra.mxu0 %v771_v9  ;;  %v1261_v63 = vld [vmem:[%s2311_s11 + $0x38] sm:$0xff]  ;;  %v1260_v1 = vld [vmem:[%s2311_s11 + $0x30] sm:$0xff] }
  0x6b   : > { %1560 = vmatprep.subr.mxu1 %v1885_v0  ;;  %1586 = vmatprep.subr.mxu0 %v1885_v0  ;;  %v1056_v33 = vld [vmem:[#allocation5 + $0x10] sm:$0xff]  ;;  %v1257_v4 = vld [vmem:[%s2311_s11 + $0x18] sm:$0xff]  ;;  %p1812_p1 = pnand %p1811_p11, %p2364_p0 }
  0x6c   : > { %1561 = vmatpush3.msra.mxu1 %v596_v2  ;;  %1587 = vmatpush3.msra.mxu0 %v770_v11  ;;  %v1489_v35 = vld [vmem:[%s2302_s2] ss:$0 sm:$0xff]  ;;  %v1259_v2 = vld [vmem:[%s2311_s11 + $0x28] sm:$0xff] }
  0x6d   : > { %1562 = vmatprep.subr.mxu1 %v1885_v0  ;;  %1589 = vmatmul.mubr.msk.f32.vlgmr.msra.gmra.mxu0 %vm605_vm1, %v2136_v7  ;;  %v1500_v48 = vld [vmem:[%s2308_s8] ss:$0 sm:$0xff]  ;;  %s2363_s15 = smov %s2362_s24  ;;  %s1386_s0 = scalar_lea.hbm %s2362_s24, %s1511_s21 }
  0x6e   : > { %1563 = vmatpush3.msra.mxu1 %v595_v3  ;;  %1610 = vmatprep.subr.mxu0 %v1885_v0  ;;  %v1171_v60 = vld [vmem:[#allocation7 + $0x10] sm:$0xff]  ;;  %p1813_p2 = pneg %p1812_p1 }
  0x6f   : > { %1564 = vmatprep.subr.mxu1 %v1885_v0  ;;  %1618 = vmatprep.mubr.msk.f32.mxu0 %vm1886_vm0, %v1885_v0  ;;  %v1258_v3 = vld [vmem:[%s2311_s11 + $0x20] sm:$0xff] }
  0x70   : > { %1565 = vmatpush3.msra.mxu1 %v594_v6  ;;  %1611 = vmatpush3.msra.mxu0 %v1057_v32  ;;  %v1502_v9 = vld [vmem:[%s2313_s13] ss:$0 sm:$0xff] }
  0x71   : > { %1567 = vmatmul.mubr.msk.f32.vlgmr.msra.gmra.mxu1 %vm605_vm1, %v2136_v7  ;;  %1569 = vmatprep.subr.mxu1 %v1885_v0  ;;  %v1503_v11 = vld [vmem:[%s2314_s14] ss:$0 sm:$0xff] }
  0x72   : > { %1570 = vmatpush3.msra.mxu1 %v687_v8  ;;  %1577 = vmatprep.mubr.msk.f32.mxu1 %vm1886_vm0, %v1885_v0 }
  0x73   : > { %1571 = vmatprep.subr.mxu1 %v1885_v0  ;;  %1612 = vmatprep.subr.mxu0 %v1885_v0 }
  0x74   : > { %1572 = vmatpush3.msra.mxu1 %v686_v10  ;;  %1613 = vmatpush3.msra.mxu0 %v1056_v33 }
  0x75   : > { %1573 = vmatprep.subr.mxu1 %v1885_v0  ;;  %1614 = vmatprep.subr.mxu0 %v1885_v0 }
  0x76   : > { %1574 = vmatpush3.msra.mxu1 %v685_v12  ;;  %1615 = vmatpush3.msra.mxu0 %v1055_v34 }
  0x77   : > { %1575 = vmatprep.subr.mxu1 %v1885_v0  ;;  %1616 = vmatprep.subr.mxu0 %v1885_v0 }
  0x78   : > { %1576 = vmatpush3.msra.mxu1 %v684_v13  ;;  %1617 = vmatpush3.msra.mxu0 %v1054_v45 }
  0x79   : > { %1578 = vmatmul.mubr.msk.f32.vlgmr.msra.gmra.mxu1 %vm605_vm1, %v2136_v7  ;;  %1632 = vmatprep.subr.mxu0 %v1885_v0 }
 0x12d   : > { %v847_v17 = vpop.f32.mrf.mxu0 }
 0x12e   : > { %v848_v19 = vadd.f32 %v1493_v16, %v847_v17  ;;  %v1254_v16 = vld [vmem:[%s2311_s11] sm:$0xff] }
 0x12f   : > { %v1590_v20 = vpop.f32.mrf.mxu0  ;;  %v1504_v17 = vld [vmem:[%s2310_s10] ss:$0 sm:$0xff] }
 0x130   : > { %1591 = vmatprep.subr.mxu1 %v848_v19 }
 0x131   : > { %v675_v14 = vpop.f32.mrf.mxu1  ;;  %1592 = vmatpush3.msra.mxu1 %v848_v19 }
 0x132   : > { %1599 = vmatprep.subr.mxu1 %v1885_v0  ;;  %v676_v36 = vadd.f32 %v1489_v35, %v675_v14  ;;  %v1256_v14 = vld [vmem:[%s2311_s11 + $0x10] sm:$0xff] }
 0x133   : > { %v1568_v15 = vpop.f32.mrf.mxu1 }
 0x134   : > { %v681_v37 = vmul.f32 1.442695, %v676_v36  ;;  %v680_v43 = vadd.f32 1.0, %v676_v36  ;;  %vm679_vm4 = vcmp.gt.f32.partialorder %v676_v36, 0.0  ;;  %v1255_v15 = vld [vmem:[%s2311_s11 + $0x8] sm:$0xff] }
 0x135   : > { %v1508_v36 = vld [vmem:[%s2360_s29] ss:$0 sm:$0xff]  ;;  %s1887_s29 = smov [#allocation8]  }
 0x136   : > { %s1814_s28 = sshll.u32 %s1887_s29, 4  ;;  %s1815_s28 = int_to_ptr.vmem [resolvable:$false] %s1814_s28 }
 0x137   : > { %s1816_s20 = scalar_lea.vmem %s1815_s28, 256  ;;  %p1817_p6 = scmp.lt.s32.totalorder %s1389_s9, %s1815_s28 }
 0x138   : > { %p1818_p12 = scmp.lt.s32.totalorder %s1816_s20, %s1810_s22 }
 0x139   : > { %v761_v21 = vpop.f32.mrf.mxu1 }
 0x13a   : > { %v762_v22 = vadd.f32 %v1491_v18, %v761_v21  ;;  %p1819_p7 = por %p1818_p12, %p1817_p6 }
 0x13b   : > { %v1579_v23 = vpop.f32.mrf.mxu1 }
 0x13c   : > { %v767_v24 = vmul.f32 1.442695, %v762_v22  ;;  %v766_v25 = vadd.f32 1.0, %v762_v22  ;;  %vm765_vm2 = vcmp.gt.f32.partialorder %v762_v22, 0.0  ;;  %v1506_v22 = vld [vmem:[%s2312_s12] ss:$0 sm:$0xff]  ;;  %p1820_p9 = pnand %p1819_p7, %p1813_p2 }
 0x13e   : > { %1722 = vpow2.f32 %v767_v24 }
 0x13f   : > { %1724 = vpow2.f32 %v681_v37 }
 0x14b   : > { %v1723_v26 = vpop.eup %1722 }
 0x14c   : > { %v769_v27 = vsel %vm765_vm2, %v766_v25, %v1723_v26  ;;  %v1725_v42 = vpop.eup %1724 }
 0x14d   : > { %851 = vxpose.xlu0.b32.start.end [1/1] (short) (narrow) %v769_v27, 32  ;;  %v683_v44 = vsel %vm679_vm4, %v680_v43, %v1725_v42 }
 0x1c9   : > { %v867_v28 = vpop.trf.xlu0 }
 0x1ca   : > { %1593 = vmatprep.mubr.msk.f32.mxu1 %vm883_vm3, %v867_v28 }
 0x1cd   : > { %v868_v29 = vpop.trf.xlu0 }
 0x1ce   : > { %1594 = vmatmul.mubr.msk.f32.vlgmr.msra.gmra.mxu1 %vm883_vm3, %v868_v29 }
 0x1d1   : > { %v869_v30 = vpop.trf.xlu0 }
 0x1d2   : > { %1596 = vmatprep.mubr.msk.f32.mxu1 %vm883_vm3, %v869_v30 }
 0x1d5   : > { %v870_v31 = vpop.trf.xlu0 }
 0x1d6   : > { %1597 = vmatmul.mubr.msk.f32.gmra.mxu1 %vm883_vm3, %v870_v31 }
 0x1d7   : > { %1607 = vmatprep.mubr.msk.f32.mxu1 %vm1886_vm0, %v1885_v0 }
 0x28e   : > { %v1595_v38 = vpop.f32.mrf.mxu1 }
 0x290   : > { %v962_v39 = vpop.f32.mrf.mxu1 }
 0x296   : > { %v1598_v40 = vpop.f32.mrf.mxu1 }
 0x297   : > { %1600 = vmatpush3.msra.mxu1 %v1598_v40 }
 0x298   : > { %v972_v41 = vpop.f32.mrf.mxu1  ;;  %1601 = vmatprep.subr.mxu1 %v1885_v0 }
 0x299   : > { %1602 = vmatpush3.msra.mxu1 %v972_v41 }
 0x29a   : > { %1603 = vmatprep.subr.mxu1 %v1885_v0 }
 0x29b   : > { %1604 = vmatpush3.msra.mxu1 %v1595_v38  ;;  %v1509_v38 = vld [vmem:[%s2361_s1] ss:$0 sm:$0xff] }
 0x29c   : > { %1605 = vmatprep.subr.mxu1 %v1885_v0 }
 0x29d   : > { %1606 = vmatpush3.msra.mxu1 %v962_v39 }
 0x29e   : > { %1608 = vmatmul.mubr.msk.f32.vlgmr.msra.gmra.mxu1 %vm605_vm1, %v683_v44  ;;  %1621 = vmatprep.subr.mxu1 %v1885_v0 }
 0x29f   : > { %1629 = vmatprep.mubr.msk.f32.mxu1 %vm1886_vm0, %v1885_v0  ;;  %1622 = vmatpush3.msra.mxu1 %v1172_v59 }
 0x2a0   : > { %1623 = vmatprep.subr.mxu1 %v1885_v0 }
 0x2a1   : > { %1624 = vmatpush3.msra.mxu1 %v1171_v60 }
 0x2a2   : > { %1625 = vmatprep.subr.mxu1 %v1885_v0 }
 0x2a3   : > { %1626 = vmatpush3.msra.mxu1 %v1170_v61 }
 0x2a4   : > { %1627 = vmatprep.subr.mxu1 %v1885_v0 }
 0x2a5   : > { %1628 = vmatpush3.msra.mxu1 %v1169_v62 }
 0x35e   : > { %v1050_v46 = vpop.f32.mrf.mxu1 }
 0x35f   : > { %1619 = vmatmul.mubr.msk.f32.vlgmr.msra.gmra.mxu0 %vm605_vm1, %v1050_v46 }
 0x360   : > { %v1609_v47 = vpop.f32.mrf.mxu1  ;;  %1648 = vmatprep.mubr.msk.f32.mxu0 %vm1886_vm0, %v1885_v0  ;;  %1633 = vmatpush3.msra.mxu0 %v1261_v63 }
 0x361   : > { %1634 = vmatprep.subr.mxu0 %v1885_v0 }
 0x362   : > { %1635 = vmatpush3.msra.mxu0 %v1260_v1 }
 0x363   : > { %1636 = vmatprep.subr.mxu0 %v1885_v0 }
 0x364   : > { %1637 = vmatpush3.msra.mxu0 %v1259_v2 }
 0x365   : > { %1638 = vmatprep.subr.mxu0 %v1885_v0 }
 0x366   : > { %1639 = vmatpush3.msra.mxu0 %v1258_v3 }
 0x367   : > { %1640 = vmatprep.subr.mxu0 %v1885_v0 }
 0x368   : > { %1641 = vmatpush3.msra.mxu0 %v1257_v4 }
 0x369   : > { %1642 = vmatprep.subr.mxu0 %v1885_v0 }
 0x36a   : > { %1643 = vmatpush3.msra.mxu0 %v1256_v14 }
 0x36b   : > { %1644 = vmatprep.subr.mxu0 %v1885_v0 }
 0x36c   : > { %1645 = vmatpush3.msra.mxu0 %v1255_v15 }
 0x36d   : > { %1646 = vmatprep.subr.mxu0 %v1885_v0 }
 0x36e   : > { %1647 = vmatpush3.msra.mxu0 %v1254_v16 }
 0x41f   : > { %v1134_v49 = vpop.f32.mrf.mxu0 }
 0x420   : > { %v1135_v50 = vadd.f32 %v1500_v48, %v1134_v49 }
 0x421   : > { %v1620_v51 = vpop.f32.mrf.mxu0 }
 0x422   : > { %v1138_v52 = vadd.f32 %v1135_v50, %v2136_v7 }
 0x424   : > { %v1141_v53 = vsel %vm605_vm1, %v1138_v52, 0.0 }
 0x425   : > { %1142 = vadd.xlane.f32.xlu0 %v1141_v53 }
 0x4ae   : > { %v1143_v54 = vpop.xlane.xlu0 %1142 }
 0x4af   : > { %v1145_v55 = vmul.f32 0.03125, %v1143_v54 }
 0x4b1   : > { %v1146_v56 = vsub.f32 %v1138_v52, %v1145_v55 }
 0x4b3   : > { %v1147_v57 = vmul.f32 %v1146_v56, %v1146_v56 }
 0x4b5   : > { %v1148_v58 = vsel %vm605_vm1, %v1147_v57, 0.0 }
 0x4b6   : > { %1149 = vadd.xlane.f32.xlu1 %v1148_v58 }
 0x53f   : > { %v1150_v5 = vpop.xlane.xlu1 %1149 }
 0x540   : > { %v1151_v6 = vmul.f32 0.03125, %v1150_v5 }
 0x542   : > { %v1152_v7 = vadd.f32 1e-05, %v1151_v6 }
 0x544   : > { %1726 = vrsqrt.f32 %v1152_v7 }
 0x551   : > { %v1727_v8 = vpop.eup %1726 }
 0x552   : > { %v1154_v10 = vmul.f32 %v1727_v8, %v1146_v56 }
 0x554   : > { %v1161_v12 = vmul.f32 %v1502_v9, %v1154_v10 }
 0x556   : > { %v1168_v13 = vadd.f32 %v1503_v11, %v1161_v12 }
 0x558   : > { %1630 = vmatmul.mubr.msk.f32.vlgmr.msra.gmra.mxu1 %vm605_vm1, %v1168_v13 }
 0x618   : > { %v1249_v18 = vpop.f32.mrf.mxu1 }
 0x619   : > { %v1250_v19 = vadd.f32 %v1504_v17, %v1249_v18 }
 0x61a   : > { %v1631_v20 = vpop.f32.mrf.mxu1 }
 0x61b   : > { %v1253_v21 = vmax.f32 %v1250_v19, 0.0 }
 0x61d   : > { %1649 = vmatmul.mubr.msk.f32.vlgmr.msra.gmra.mxu0 %vm1269_vm5, %v1253_v21 }
 0x6dd   : > { %v1339_v0 = vpop.f32.mrf.mxu0 }
 0x6de   : > { %v1340_v23 = vadd.f32 %v1506_v22, %v1339_v0 }
 0x6df   : > { %v1650_v24 = vpop.f32.mrf.mxu0 }
 0x6e0   : > { %v1343_v25 = vadd.f32 %v1340_v23, %v1168_v13 }
 0x6e2   : > { %v1346_v26 = vsel %vm605_vm1, %v1343_v25, 0.0 }
 0x6e3   : > { %1347 = vadd.xlane.f32.xlu1 %v1346_v26 }
 0x76c   : > { %v1348_v27 = vpop.xlane.xlu1 %1347 }
 0x76d   : > { %v1349_v28 = vmul.f32 0.03125, %v1348_v27 }
 0x76f   : > { %v1350_v29 = vsub.f32 %v1343_v25, %v1349_v28 }
 0x771   : > { %v1351_v30 = vmul.f32 %v1350_v29, %v1350_v29 }
 0x773   : > { %v1352_v31 = vsel %vm605_vm1, %v1351_v30, 0.0 }
 0x774   : > { %1353 = vadd.xlane.f32.xlu1 %v1352_v31 }
 0x7fd   : > { %v1354_v32 = vpop.xlane.xlu1 %1353 }
 0x7fe   : > { %v1355_v33 = vmul.f32 0.03125, %v1354_v32 }
 0x800   : > { %v1356_v34 = vadd.f32 1e-05, %v1355_v33 }
 0x802   : > { %1728 = vrsqrt.f32 %v1356_v34 }
 0x80f   : > { %v1729_v35 = vpop.eup %1728 }
 0x810   : > { %v1358_v37 = vmul.f32 %v1729_v35, %v1350_v29 }
 0x812   : > { %v1365_v39 = vmul.f32 %v1508_v36, %v1358_v37 }
 0x814   : > { %v1372_v40 = vadd.f32 %v1509_v38, %v1365_v39 }
 0x816   : > { %1373 = vst.msk [vmem:[%s592_s27] sm:$0xff] %vm605_vm1, %v1372_v40 }
 0x817   : > { %1823 = shalt.err (!%p1820_p9)
}
 0x818   : > { %s1824_s19 = scalar_lea.hbm %s1386_s0, 128  ;;  %s1828_s1 = scalar_lea.hbm %s2363_s15, 256 }
 0x819   : > { %p1825_p13 = scmp.ne.s32.totalorder %s1386_s0, %s1824_s19  ;;  %p1829_p4 = scmp.lt.s32.totalorder %s1386_s0, %s2363_s15 }
 0x81a   : > { %p1830_p8 = scmp.lt.s32.totalorder %s1828_s1, %s1824_s19 }
 0x81b   : > { %p1826_p5 = pnand %p1825_p13, %p2364_p0 }
 0x81c   : > { %p1831_p3 = por %p1830_p8, %p1829_p4 }
 0x81d   : > { %p1827_p10 = pneg %p1826_p5 }
 0x81f   : > { %p1832_p11 = pnand %p1831_p3, %p1827_p10 }
 0x821   : > { %1835 = shalt.err (!%p1832_p11)
}
 0x822   : > { %1661 = dma.vmem_to_hbm [thread:$0]  (%p2364_p0), %s1389_s9, 128, %s1386_s0, %s1375_s30  }
 0x823 PF: > { %s2365_s16 = sld [smem:[#allocation12_spill]] }
 0x824   : > { %s2366_s18 = sld [smem:[#allocation15_spill]] }
 0x825   : > { %s2367_s24 = sld [smem:[#allocation14_spill]] }
 0x829   : > { %s1400_s22 = sand.u32 1, %s2365_s16  }
 0x82a   : > { %p2368_p1 = scmp.ne.s32.totalorder %s2366_s18, 0  ;;  %s1401_s29 = scalar_lea.sflag [#allocation4], %s1400_s22 }
 0x82b   : > { %p2369_p2 = scmp.ge.s32.totalorder %s2367_s24, 2 }
 0x82d   : > { %p1675_p6 = pnand %p2369_p2, %p2368_p1 }
 0x82f   : > { %p1676_p12 = pneg %p1675_p6 }
 0x831   : > { %1861 = dma.done.wait (%p1676_p12), %s1401_s29, 128  }
 0x832   : > { %1863 = vsyncadd (%p1676_p12), %s1401_s29, 4294967168  ;;  %s2370_s27 = sld [smem:[#allocation16_spill]]  ;;  %s2373_s24 = smov %s1870_s25 }
 0x833   : > { %s2371_s28 = sld [smem:[#allocation13_spill]] }
 0x834   : > { %s2372_s26 = sld [smem:[#allocation17_spill]] }
 0x838   : > { %p31_p7 = scmp.ge.s32.totalorder %s2370_s27, 4  }
 0x839   : > { %s2374_s25 = smov %s2371_s28 }
 0x83a   :  { %33 = sbr.rel (!%p31_p7) target bundleno = 14 (0xe), region = 141 }
 0x83f   :  { %1406 = vsyncpa [#allocation3], 1 }
 0x840   :  { %1408 = vsyncpa [#allocation3 + $0x1], 1 }
 0x841   :  { %1409 = vsyncpa [#allocation6], 1 }
 0x842   :  { %1410 = vsyncpa [#allocation4], 1 }
 0x843   :  { %1412 = vsyncpa [#allocation4 + $0x1], 1 }

</bundles_post_ra>
